<compile_context>
chip_gen: v7x
topology: tpu7x:2x2x1
jax: 0.10.0
libtpu: 0.0.40
codegen_flags: <defaults>
</compile_context>

<pallas_src>
import functools

import jax
import jax.numpy as jnp
from jax.experimental import pallas as pl
from jax.experimental.pallas import tpu as pltpu

NUM_CLASSES = 16
TEMPERATURE = 3.0
ALPHA = 1.0          # module default (cls term has zero weight)

PAD_N = 128          # lane-dense logit width (real classes in lanes 0:NUM_CLASSES)
LOSS_LANE = 64       # unused lane that carries the per-row loss contribution
TM_MAX = 512         # batch-tile rows; ~85% HBM roofline on v6e, fits default
                     # scoped VMEM on v5e/v7x for F up to several thousand.
NEG_INF = -1e30


# ---------------------------------------------------------------------------
# One-time parameter preparation (call OUTSIDE the training step):
# pad student/teacher classifiers to 128 lanes and optionally cast to bf16.
# This removes the per-call concat+cast HBM round-trip flagged in review.
# ---------------------------------------------------------------------------
def prepare_kd_params(ws, bs, wt, bt, *, param_dtype=jnp.float32):
    def pad_w(w):
        f = w.shape[0]
        out = jnp.zeros((f, PAD_N), w.dtype).at[:, :NUM_CLASSES].set(w)
        return out.astype(param_dtype)

    def pad_b(b):
        b = jnp.reshape(b, (1, -1)).astype(jnp.float32)
        return jnp.zeros((1, PAD_N), jnp.float32).at[:, :NUM_CLASSES].set(b)

    return {"ws": pad_w(ws), "bs": pad_b(bs), "wt": pad_w(wt), "bt": pad_b(bt)}


# ---------------------------------------------------------------------------
# Fused kernel (one batch tile per grid step):
#   s_pad = x @ ws_pad + bs_pad            [tm, 128]  (student, lanes 0:16)
#   t_pad = x @ wt_pad + bt_pad            [tm, 128]  (teacher, lanes 0:16)
#   kd_row  = sum_c softmax(t/T) * (log_softmax(t/T) - log_softmax(s/T)) * T^2/NC
#   ce_row  = -log_softmax(s)[target]                  (only if alpha != 1)
#   out[:, 0:16]      = student logits
#   out[:, LOSS_LANE] = alpha*kd_row + (1-alpha)/B * ce_row   (per-row partial)
# ---------------------------------------------------------------------------
def _kd_kernel(*refs, temperature, alpha, num_classes, batch, block_rows,
               with_teacher, with_ce):
    if with_teacher and with_ce:
        x_ref, ws_ref, bs_ref, wt_ref, bt_ref, tgt_ref, out_ref = refs
    elif with_teacher:
        x_ref, ws_ref, bs_ref, wt_ref, bt_ref, out_ref = refs
    else:
        x_ref, ws_ref, bs_ref, out_ref = refs

    # Cast the x tile to the weight dtype in VMEM only (bf16 MXU streaming
    # without any wrapper-side HBM re-write of x).
    xc = x_ref[...].astype(ws_ref.dtype)

    # Student logits, lane-dense [tm, 128]; padded lanes are exactly 0.
    s_pad = (jnp.dot(xc, ws_ref[...], preferred_element_type=jnp.float32)
             + bs_ref[...])

    lane = jax.lax.broadcasted_iota(jnp.int32, (block_rows, PAD_N), 1)
    class_mask = lane < num_classes

    loss_row = jnp.zeros((block_rows, 1), jnp.float32)

    if with_teacher:
        t_pad = (jnp.dot(xc, wt_ref[...], preferred_element_type=jnp.float32)
                 + bt_ref[...])

        # Mask padded lanes to -inf-ish so they contribute exp()=0 to softmax.
        s_m = jnp.where(class_mask, s_pad, NEG_INF)
        t_m = jnp.where(class_mask, t_pad, NEG_INF)

        inv_t = 1.0 / temperature
        s_t = s_m * inv_t
        t_t = t_m * inv_t

        s_max = jnp.max(s_t, axis=1, keepdims=True)
        s_lse = jnp.log(jnp.sum(jnp.exp(s_t - s_max), axis=1, keepdims=True))
        s_logsm = s_t - s_max - s_lse                        # log_softmax(s/T)

        t_max = jnp.max(t_t, axis=1, keepdims=True)
        t_exp = jnp.exp(t_t - t_max)
        t_sum = jnp.sum(t_exp, axis=1, keepdims=True)
        t_sm = t_exp / t_sum                                 # softmax(t/T)
        t_logsm = (t_t - t_max) - jnp.log(t_sum)             # log_softmax(t/T)

        kd_elem = jnp.where(class_mask, t_sm * (t_logsm - s_logsm), 0.0)
        kd_row = (jnp.sum(kd_elem, axis=1, keepdims=True)
                  * (temperature * temperature / num_classes))
        loss_row = loss_row + alpha * kd_row

        if with_ce:
            tgt = tgt_ref[...]                               # [tm, 1] int32
            s_max_r = jnp.max(s_m, axis=1, keepdims=True)
            s_lse_r = jnp.log(jnp.sum(jnp.exp(s_m - s_max_r), axis=1,
                                      keepdims=True))
            s_logsm_r = s_m - s_max_r - s_lse_r
            ce_row = -jnp.sum(jnp.where(lane == tgt, s_logsm_r, 0.0),
                              axis=1, keepdims=True)
            loss_row = loss_row + ((1.0 - alpha) / batch) * ce_row

        # Zero loss contributions of padded rows in a partial last tile
        # (their stores are clipped anyway; this also kills any NaN there).
        row = (pl.program_id(0) * block_rows
               + jax.lax.broadcasted_iota(jnp.int32, (block_rows, 1), 0))
        loss_row = jnp.where(row < batch, loss_row, 0.0)

    # Single lane-dense store: student logits + loss column in one block.
    out_ref[...] = jnp.where(lane == LOSS_LANE, loss_row,
                             s_pad).astype(out_ref.dtype)


# ---------------------------------------------------------------------------
# Wrapper.
# ---------------------------------------------------------------------------
def ml_softmax_kd_forward(x, target, params, *, training=True, alpha=ALPHA,
                          temperature=TEMPERATURE, block_rows=TM_MAX):
    B = x.shape[0]
    x_flat = x.reshape(B, -1)                 # row-major, matches torch .view
    F = x_flat.shape[1]

    # Batch tile: min(TM_MAX, B) always satisfies the (8,128) block rule
    # (either divisible by 8 or equal to the full batch dim).
    tm = min(block_rows, B)
    num_tiles = pl.cdiv(B, tm)

    with_teacher = bool(training)
    with_ce = with_teacher and (float(alpha) != 1.0)

    kernel = functools.partial(
        _kd_kernel, temperature=float(temperature), alpha=float(alpha),
        num_classes=NUM_CLASSES, batch=B, block_rows=tm,
        with_teacher=with_teacher, with_ce=with_ce)

    x_spec = pl.BlockSpec((tm, F), lambda i: (i, 0))           # streamed
    w_spec = pl.BlockSpec((F, PAD_N), lambda i: (0, 0))        # VMEM-resident
    b_spec = pl.BlockSpec((1, PAD_N), lambda i: (0, 0))        # VMEM-resident
    out_spec = pl.BlockSpec((tm, PAD_N), lambda i: (i, 0))     # lane-dense

    inputs = [x_flat, params["ws"], params["bs"]]
    in_specs = [x_spec, w_spec, b_spec]
    if with_teacher:
        inputs += [params["wt"], params["bt"]]
        in_specs += [w_spec, b_spec]
        if with_ce:
            # TODO(synk): move target to SMEM scalar-prefetch to drop this
            # 1-lane VMEM block (minor; CE path is off at the default alpha=1).
            inputs.append(target.astype(jnp.int32).reshape(B, 1))
            in_specs.append(pl.BlockSpec((tm, 1), lambda i: (i, 0)))

    out_pad = pl.pallas_call(
        kernel,
        grid=(num_tiles,),
        in_specs=in_specs,
        out_specs=out_spec,
        out_shape=jax.ShapeDtypeStruct((B, PAD_N), jnp.float32),
        compiler_params=pltpu.CompilerParams(
            # Per-tile partial losses keep the batch axis reduction-free, so
            # it can shard across v7x's two TensorCores.
            dimension_semantics=("parallel",),
            # Headroom above the v5e 16 MiB default; still safe on v6e/v7x.
            # Re-derive TM_MAX against 64 MiB physical VMEM on v7x at large F.
            vmem_limit_bytes=32 * 1024 * 1024),
    )(*inputs)

    s_out = out_pad[:, :NUM_CLASSES]
    if with_teacher:
        total = jnp.sum(out_pad[:, LOSS_LANE])
        loss = jnp.zeros((B,), jnp.float32).at[0].set(total)
    else:
        loss = jnp.zeros((B,), jnp.float32)
    return s_out, loss


# ---------------------------------------------------------------------------
# Pure-JAX reference for validation.
# ---------------------------------------------------------------------------
def _reference(x, target, ws, bs, wt, bt, *, alpha=ALPHA,
               temperature=TEMPERATURE):
    B = x.shape[0]
    xf = x.reshape(B, -1).astype(jnp.float32)
    s = xf @ ws + bs
    t = xf @ wt + bt
    T = temperature
    log_p_s = jax.nn.log_softmax(s / T, axis=1)
    p_t = jax.nn.softmax(t / T, axis=1)
    kd = jnp.sum(p_t * (jnp.log(p_t) - log_p_s)) * T * T / NUM_CLASSES
    ce = -jnp.mean(jnp.sum(jax.nn.one_hot(target, NUM_CLASSES)
                           * jax.nn.log_softmax(s, axis=1), axis=1))
    total = ce * (1.0 - alpha) + kd * alpha
    loss = jnp.zeros((B,), jnp.float32).at[0].set(total)
    return s, loss


if __name__ == "__main__":
    key = jax.random.PRNGKey(0)
    kx, kt, k1, k2, k3, k4 = jax.random.split(key, 6)

    B, C, H, W = 2, 4, 16, 16
    F = C * H * W  # 1024 flattened features

    x = jax.random.normal(kx, (B, C, H, W), dtype=jnp.float32)
    target = jax.random.randint(kt, (B,), 0, NUM_CLASSES)

    # Deterministic synthetic "student" and "teacher" classifier weights.
    ws = jax.random.normal(k1, (F, NUM_CLASSES), dtype=jnp.float32) * 0.02
    bs = jax.random.normal(k2, (1, NUM_CLASSES), dtype=jnp.float32) * 0.02
    wt = jax.random.normal(k3, (F, NUM_CLASSES), dtype=jnp.float32) * 0.02
    bt = jax.random.normal(k4, (1, NUM_CLASSES), dtype=jnp.float32) * 0.02

    s_ref, loss_ref = _reference(x, target, ws, bs, wt, bt)

    # Parameter pad/cast happens ONCE, outside the step (no per-call concat).
    params_f32 = prepare_kd_params(ws, bs, wt, bt)
    params_bf16 = prepare_kd_params(ws, bs, wt, bt, param_dtype=jnp.bfloat16)

    # --- f32 path, module default alpha=1.0 (pure KD; CE skipped in-kernel).
    s_out, loss = ml_softmax_kd_forward(x, target, params_f32)
    jax.block_until_ready((s_out, loss))
    assert jnp.allclose(s_out, s_ref, atol=1e-4, rtol=1e-4)
    assert jnp.allclose(loss, loss_ref, atol=1e-4, rtol=1e-4)

    # --- alpha != 1 exercises the in-kernel one-hot cross-entropy branch.
    s_out2, loss2 = ml_softmax_kd_forward(x, target, params_f32, alpha=0.7)
    jax.block_until_ready((s_out2, loss2))
    s_ref2, loss_ref2 = _reference(x, target, ws, bs, wt, bt, alpha=0.7)
    assert jnp.allclose(s_out2, s_ref2, atol=1e-4, rtol=1e-4)
    assert jnp.allclose(loss2, loss_ref2, atol=1e-4, rtol=1e-4)

    # --- bf16 parameter streaming: params stored bf16 (cast once above);
    #     x cast to bf16 only inside VMEM; all loss math stays f32.
    s_bf, loss_bf = ml_softmax_kd_forward(x, target, params_bf16)
    jax.block_until_ready((s_bf, loss_bf))
    assert jnp.allclose(s_bf, s_ref, atol=5e-2, rtol=5e-2)
    assert jnp.allclose(loss_bf, loss_ref, atol=5e-2, rtol=5e-2)

    # --- eval path: student logits only, zero loss.
    s_eval, loss_eval = ml_softmax_kd_forward(x, target, params_f32,
                                              training=False)
    jax.block_until_ready((s_eval, loss_eval))
    assert jnp.allclose(s_eval, s_ref, atol=1e-4, rtol=1e-4)
    assert jnp.allclose(loss_eval, jnp.zeros((B,), jnp.float32))

    print("KERNEL_OK")
</pallas_src>

<mosaic_0001>
module attributes {stable_mosaic.version = 11 : i64} {
  func.func @_kd_kernel(%arg0: i32, %arg1: memref<2x1024xf32, #tpu.memory_space<vmem>>, %arg2: memref<1024x128xf32, #tpu.memory_space<vmem>>, %arg3: memref<1x128xf32, #tpu.memory_space<vmem>>, %arg4: memref<1024x128xf32, #tpu.memory_space<vmem>>, %arg5: memref<1x128xf32, #tpu.memory_space<vmem>>, %arg6: memref<2x128xf32, #tpu.memory_space<vmem>>) attributes {dimension_semantics = [#tpu.dimension_semantics<parallel>], iteration_bounds = array<i64: 1>, scalar_prefetch = 0 : i64, scratch_operands = 0 : i64, tpu.core_type = #tpu.core_type<tc>, window_params = [{transform_indices = @transform_0, window_bounds = array<i64: 2, 1024>}, {pipeline_mode = #tpu.pipeline_mode<synchronous>, transform_indices = @transform_1, window_bounds = array<i64: 1024, 128>}, {pipeline_mode = #tpu.pipeline_mode<synchronous>, transform_indices = @transform_2, window_bounds = array<i64: 1, 128>}, {pipeline_mode = #tpu.pipeline_mode<synchronous>, transform_indices = @transform_3, window_bounds = array<i64: 1024, 128>}, {pipeline_mode = #tpu.pipeline_mode<synchronous>, transform_indices = @transform_4, window_bounds = array<i64: 1, 128>}, {transform_indices = @transform_5, window_bounds = array<i64: 2, 128>}]} {
    %c0 = arith.constant 0 : index
    %c0_0 = arith.constant 0 : index
    %0 = vector.load %arg1[%c0, %c0_0] : memref<2x1024xf32, #tpu.memory_space<vmem>>, vector<2x1024xf32>
    %c0_1 = arith.constant 0 : index
    %c0_2 = arith.constant 0 : index
    %1 = vector.load %arg2[%c0_1, %c0_2] : memref<1024x128xf32, #tpu.memory_space<vmem>>, vector<1024x128xf32>
    %cst = arith.constant dense<0.000000e+00> : vector<2x128xf32>
    %2 = tpu.matmul %0, %1, %cst {dimension_numbers = #tpu.dot_dimension_numbers<[1], [0], [0], [1], [0, 0, 1, 1], [], []>} : vector<2x1024xf32>, vector<1024x128xf32>, vector<2x128xf32> -> vector<2x128xf32>
    %c0_3 = arith.constant 0 : index
    %c0_4 = arith.constant 0 : index
    %3 = vector.load %arg3[%c0_3, %c0_4] : memref<1x128xf32, #tpu.memory_space<vmem>>, vector<1x128xf32>
    %4 = vector.broadcast %3 : vector<1x128xf32> to vector<2x128xf32>
    %5 = arith.addf %2, %4 : vector<2x128xf32>
    %6 = tpu.iota {dimensions = array<i32: 1>} : vector<2x128xi32>
    %c16_i32 = arith.constant 16 : i32
    %7 = vector.broadcast %c16_i32 : i32 to vector<2x128xi32>
    %8 = arith.cmpi slt, %6, %7 : vector<2x128xi32>
    %cst_5 = arith.constant 0.000000e+00 : f32
    %9 = vector.broadcast %cst_5 : f32 to vector<2x1xf32>
    %c0_6 = arith.constant 0 : index
    %c0_7 = arith.constant 0 : index
    %10 = vector.load %arg4[%c0_6, %c0_7] : memref<1024x128xf32, #tpu.memory_space<vmem>>, vector<1024x128xf32>
    %cst_8 = arith.constant dense<0.000000e+00> : vector<2x128xf32>
    %11 = tpu.matmul %0, %10, %cst_8 {dimension_numbers = #tpu.dot_dimension_numbers<[1], [0], [0], [1], [0, 0, 1, 1], [], []>} : vector<2x1024xf32>, vector<1024x128xf32>, vector<2x128xf32> -> vector<2x128xf32>
    %c0_9 = arith.constant 0 : index
    %c0_10 = arith.constant 0 : index
    %12 = vector.load %arg5[%c0_9, %c0_10] : memref<1x128xf32, #tpu.memory_space<vmem>>, vector<1x128xf32>
    %13 = vector.broadcast %12 : vector<1x128xf32> to vector<2x128xf32>
    %14 = arith.addf %11, %13 : vector<2x128xf32>
    %cst_11 = arith.constant -1.000000e+30 : f32
    %15 = vector.broadcast %cst_11 : f32 to vector<2x128xf32>
    %16 = arith.select %8, %5, %15 : vector<2x128xi1>, vector<2x128xf32>
    %cst_12 = arith.constant -1.000000e+30 : f32
    %17 = vector.broadcast %cst_12 : f32 to vector<2x128xf32>
    %18 = arith.select %8, %14, %17 : vector<2x128xi1>, vector<2x128xf32>
    %cst_13 = arith.constant 0.333333343 : f32
    %19 = vector.broadcast %cst_13 : f32 to vector<2x128xf32>
    %20 = arith.mulf %16, %19 : vector<2x128xf32>
    %cst_14 = arith.constant 0.333333343 : f32
    %21 = vector.broadcast %cst_14 : f32 to vector<2x128xf32>
    %22 = arith.mulf %18, %21 : vector<2x128xf32>
    %cst_15 = arith.constant dense<0xFF800000> : vector<2xf32>
    %23 = vector.multi_reduction <maximumf>, %20, %cst_15 [1] : vector<2x128xf32> to vector<2xf32>
    %24 = vector.shape_cast %23 : vector<2xf32> to vector<2x1xf32>
    %25 = vector.broadcast %24 : vector<2x1xf32> to vector<2x128xf32>
    %26 = arith.subf %20, %25 : vector<2x128xf32>
    %27 = math.exp %26 : vector<2x128xf32>
    %cst_16 = arith.constant dense<0.000000e+00> : vector<2xf32>
    %28 = vector.multi_reduction <add>, %27, %cst_16 [1] : vector<2x128xf32> to vector<2xf32>
    %29 = vector.shape_cast %28 : vector<2xf32> to vector<2x1xf32>
    %30 = math.log %29 : vector<2x1xf32>
    %31 = vector.broadcast %24 : vector<2x1xf32> to vector<2x128xf32>
    %32 = arith.subf %20, %31 : vector<2x128xf32>
    %33 = vector.broadcast %30 : vector<2x1xf32> to vector<2x128xf32>
    %34 = arith.subf %32, %33 : vector<2x128xf32>
    %cst_17 = arith.constant dense<0xFF800000> : vector<2xf32>
    %35 = vector.multi_reduction <maximumf>, %22, %cst_17 [1] : vector<2x128xf32> to vector<2xf32>
    %36 = vector.shape_cast %35 : vector<2xf32> to vector<2x1xf32>
    %37 = vector.broadcast %36 : vector<2x1xf32> to vector<2x128xf32>
    %38 = arith.subf %22, %37 : vector<2x128xf32>
    %39 = math.exp %38 : vector<2x128xf32>
    %cst_18 = arith.constant dense<0.000000e+00> : vector<2xf32>
    %40 = vector.multi_reduction <add>, %39, %cst_18 [1] : vector<2x128xf32> to vector<2xf32>
    %41 = vector.shape_cast %40 : vector<2xf32> to vector<2x1xf32>
    %42 = vector.broadcast %41 : vector<2x1xf32> to vector<2x128xf32>
    %43 = arith.divf %39, %42 : vector<2x128xf32>
    %44 = vector.broadcast %36 : vector<2x1xf32> to vector<2x128xf32>
    %45 = arith.subf %22, %44 : vector<2x128xf32>
    %46 = math.log %41 : vector<2x1xf32>
    %47 = vector.broadcast %46 : vector<2x1xf32> to vector<2x128xf32>
    %48 = arith.subf %45, %47 : vector<2x128xf32>
    %49 = arith.subf %48, %34 : vector<2x128xf32>
    %50 = arith.mulf %43, %49 : vector<2x128xf32>
    %cst_19 = arith.constant 0.000000e+00 : f32
    %51 = vector.broadcast %cst_19 : f32 to vector<2x128xf32>
    %52 = arith.select %8, %50, %51 : vector<2x128xi1>, vector<2x128xf32>
    %cst_20 = arith.constant dense<0.000000e+00> : vector<2xf32>
    %53 = vector.multi_reduction <add>, %52, %cst_20 [1] : vector<2x128xf32> to vector<2xf32>
    %54 = vector.shape_cast %53 : vector<2xf32> to vector<2x1xf32>
    %cst_21 = arith.constant 5.625000e-01 : f32
    %55 = vector.broadcast %cst_21 : f32 to vector<2x1xf32>
    %56 = arith.mulf %54, %55 : vector<2x1xf32>
    %cst_22 = arith.constant 1.000000e+00 : f32
    %57 = vector.broadcast %cst_22 : f32 to vector<2x1xf32>
    %58 = arith.mulf %57, %56 : vector<2x1xf32>
    %59 = arith.addf %9, %58 : vector<2x1xf32>
    %c2_i32 = arith.constant 2 : i32
    %60 = arith.muli %arg0, %c2_i32 : i32
    %61 = tpu.iota {dimensions = array<i32: 0>} : vector<2x1xi32>
    %62 = vector.broadcast %60 : i32 to vector<2x1xi32>
    %63 = arith.addi %62, %61 : vector<2x1xi32>
    %c2_i32_23 = arith.constant 2 : i32
    %64 = vector.broadcast %c2_i32_23 : i32 to vector<2x1xi32>
    %65 = arith.cmpi slt, %63, %64 : vector<2x1xi32>
    %cst_24 = arith.constant 0.000000e+00 : f32
    %66 = vector.broadcast %cst_24 : f32 to vector<2x1xf32>
    %67 = arith.select %65, %59, %66 : vector<2x1xi1>, vector<2x1xf32>
    %c64_i32 = arith.constant 64 : i32
    %68 = vector.broadcast %c64_i32 : i32 to vector<2x128xi32>
    %69 = arith.cmpi eq, %6, %68 : vector<2x128xi32>
    %70 = vector.shape_cast %67 : vector<2x1xf32> to vector<2x1xf32>
    %71 = vector.broadcast %70 : vector<2x1xf32> to vector<2x128xf32>
    %72 = arith.select %69, %71, %5 : vector<2x128xi1>, vector<2x128xf32>
    %c0_25 = arith.constant 0 : index
    %c0_26 = arith.constant 0 : index
    %73 = vector.load %arg6[%c0_25, %c0_26] : memref<2x128xf32, #tpu.memory_space<vmem>>, vector<2x128xf32>
    tpu.vector_store %arg6[%c0_25, %c0_26], %72 {strides = array<i32>} : memref<2x128xf32, #tpu.memory_space<vmem>>, vector<2x128xf32>,
    return
  }
  func.func @transform_0(%arg0: i32) -> (i32, i32) {
    %c0_i32 = arith.constant 0 : i32
    %c0_i32_0 = arith.constant 0 : i32
    return %arg0, %c0_i32 : i32, i32
  }
  func.func @transform_1(%arg0: i32) -> (i32, i32) {
    %c0_i32 = arith.constant 0 : i32
    %c0_i32_0 = arith.constant 0 : i32
    %c0_i32_1 = arith.constant 0 : i32
    return %c0_i32, %c0_i32_0 : i32, i32
  }
  func.func @transform_2(%arg0: i32) -> (i32, i32) {
    %c0_i32 = arith.constant 0 : i32
    %c0_i32_0 = arith.constant 0 : i32
    %c0_i32_1 = arith.constant 0 : i32
    return %c0_i32, %c0_i32_0 : i32, i32
  }
  func.func @transform_3(%arg0: i32) -> (i32, i32) {
    %c0_i32 = arith.constant 0 : i32
    %c0_i32_0 = arith.constant 0 : i32
    %c0_i32_1 = arith.constant 0 : i32
    return %c0_i32, %c0_i32_0 : i32, i32
  }
  func.func @transform_4(%arg0: i32) -> (i32, i32) {
    %c0_i32 = arith.constant 0 : i32
    %c0_i32_0 = arith.constant 0 : i32
    %c0_i32_1 = arith.constant 0 : i32
    return %c0_i32, %c0_i32_0 : i32, i32
  }
  func.func @transform_5(%arg0: i32) -> (i32, i32) {
    %c0_i32 = arith.constant 0 : i32
    %c0_i32_0 = arith.constant 0 : i32
    return %arg0, %c0_i32 : i32, i32
  }
}

</mosaic_0001>

<bundles_post_ra>
// kernel: tpu_custom_call.1
= control target key start
LH: loop header
LB: loop body
LE: loop exit
PB: predicated region body
PF: predicated region fallthrough
CT: control target
= control target key end

     0   :  { %10 = vsyncpa [#allocation3], 0  ;;  %s1823_s0 = inlined_call_operand.hbm [shape: f32[2,1024], index: 0, kind: input, shape index: {}]   ;;  %s1824_s1 = inlined_call_operand.hbm [shape: f32[1024,128], index: 1, kind: input, shape index: {}]   ;;  %s1825_s2 = inlined_call_operand.vmem [shape: f32[1,128], index: 2, kind: input, shape index: {}]   ;;  %s1826_s3 = inlined_call_operand.hbm [shape: f32[1024,128], index: 3, kind: input, shape index: {}]   ;;  %s1827_s4 = inlined_call_operand.vmem [shape: f32[1,128], index: 4, kind: input, shape index: {}]   ;;  %s1828_s5 = inlined_call_operand.hbm [shape: f32[2,128], index: 5, kind: output, shape index: {}]  }
   0x1   :  { %11 = vsyncpa [#allocation6], 0 }
   0x2   :  { %12 = vsyncpa [#allocation4], 0  ;;  %s1655_s18 = smov [#allocation5]   ;;  %s1561_s22 = scalar_lea.hbm %s1824_s1, 16384 }
   0x3   :  { %s28_s19 = sshll.u32 %s1655_s18, 4  ;;  %p1562_p0 = scmp.ne.s32.totalorder %s1824_s1, %s1561_s22  ;;  %s29_s19 = int_to_ptr.vmem [resolvable:$true] %s28_s19 }
   0x4   :  { %p1565_p1 = scmp.lt.u32.totalorder %s1561_s22, %s1824_s1 }
   0x6   :  { %p1567_p2 = pnand %p1565_p1, %p1562_p0 }
   0x8   :  { %1570 = shalt.err (!%p1567_p2)
}
   0x9   :  { %s1571_s27 = scalar_lea.vmem %s29_s19, 16384  ;;  %p1576_p4 = scmp.lt.s32.totalorder %s29_s19, %s29_s19 }
   0xa   :  { %p1572_p3 = scmp.ne.s32.totalorder %s29_s19, %s1571_s27  ;;  %p1577_p5 = scmp.lt.s32.totalorder %s1571_s27, %s1571_s27 }
   0xc   :  { %p1578_p6 = por %p1577_p5, %p1576_p4 }
   0xe   :  { %p1579_p7 = pnand %p1578_p6, %p1572_p3 }
  0x10   :  { %1582 = shalt.err (!%p1579_p7)
}
  0x11   :  { %s1656_s28 = smov 128   ;;  %s1657_s29 = smov 8  }
  0x12   :  { %34 = dma.hbm_to_vmem [thread:$0]  %s1824_s1, 16384, %s29_s19, [#allocation6], %s1656_s28, %s1656_s28, %s1657_s29  }
  0x13   :  { %s1658_s7 = smov [#allocation2]   ;;  %s1659_s9 = smov [#allocation7]  }
  0x14   :  { %s19_s8 = sshll.u32 %s1658_s7, 4  ;;  %s42_s10 = sshll.u32 %s1659_s9, 4  ;;  %s20_s8 = int_to_ptr.vmem [resolvable:$true] %s19_s8  ;;  %s43_s10 = int_to_ptr.vmem [resolvable:$true] %s42_s10 }
  0x15   :  { %s1583_s13 = scalar_lea.hbm %s1823_s0, 256 }
  0x16   :  { %p1584_p8 = scmp.ne.s32.totalorder %s1823_s0, %s1583_s13  ;;  %p1587_p9 = scmp.lt.u32.totalorder %s1583_s13, %s1823_s0 }
  0x18   :  { %p1589_p10 = pnand %p1587_p9, %p1584_p8 }
  0x1a   :  { %1592 = shalt.err (!%p1589_p10)
}
  0x1b   :  { %s1593_s1 = scalar_lea.vmem %s20_s8, 256  ;;  %p1598_p12 = scmp.lt.s32.totalorder %s20_s8, %s20_s8 }
  0x1c   :  { %p1594_p11 = scmp.ne.s32.totalorder %s20_s8, %s1593_s1  ;;  %p1599_p13 = scmp.lt.s32.totalorder %s1593_s1, %s1593_s1 }
  0x1e   :  { %p1600_p0 = por %p1599_p13, %p1598_p12 }
  0x20   :  { %p1601_p1 = pnand %p1600_p0, %p1594_p11 }
  0x22   :  { %1604 = shalt.err (!%p1601_p1)
}
  0x23   :  { %22 = dma.hbm_to_vmem [thread:$0]  %s1823_s0, 256, %s20_s8, [#allocation3]  }
  0x24   :  { %s1605_s22 = scalar_lea.hbm %s1826_s3, 16384 }
  0x25   :  { %p1606_p2 = scmp.ne.s32.totalorder %s1826_s3, %s1605_s22  ;;  %p1609_p3 = scmp.lt.u32.totalorder %s1605_s22, %s1826_s3 }
  0x27   :  { %p1611_p4 = pnand %p1609_p3, %p1606_p2 }
  0x29   :  { %1614 = shalt.err (!%p1611_p4)
}
  0x2a   :  { %s1615_s27 = scalar_lea.vmem %s43_s10, 16384  ;;  %p1620_p6 = scmp.lt.s32.totalorder %s43_s10, %s43_s10 }
  0x2b   :  { %p1616_p5 = scmp.ne.s32.totalorder %s43_s10, %s1615_s27  ;;  %p1621_p7 = scmp.lt.s32.totalorder %s1615_s27, %s1615_s27 }
  0x2d   :  { %p1622_p8 = por %p1621_p7, %p1620_p6 }
  0x2f   :  { %p1623_p9 = pnand %p1622_p8, %p1616_p5 }
  0x31   :  { %1626 = shalt.err (!%p1623_p9)
}
  0x32   :  { %48 = dma.hbm_to_vmem [thread:$0]  %s1826_s3, 16384, %s43_s10, [#allocation6], %s1656_s28, %s1656_s28, %s1657_s29  }
  0x33   :  { %1649 = dma.done.wait [#allocation3], 256  }
  0x34   :  { %1650 = vsyncadd [#allocation3], 4294967040 }
  0x35   :  { %1651 = dma.done.wait [#allocation6], 32768  }
  0x36   :  { %1652 = vsyncadd [#allocation6], 4294934528  ;;  %v78_v0 = vld [vmem:[#allocation5 + $0x80] sm:$0xff]  ;;  %v79_v1 = vld [vmem:[#allocation5 + $0x88] sm:$0xff]  ;;  %v1660_v47 = vmov 1983009808   ;;  %v203_v49 = vlaneseq }
  0x37   :  { %v62_v2 = vld [vmem:[#allocation5] sm:$0xff]  ;;  %v1286_v3 = vpack.c.bf16 %v79_v1, %v78_v0  ;;  %v63_v4 = vld [vmem:[#allocation5 + $0x8] sm:$0xff]  ;;  %v80_v11 = vld [vmem:[#allocation5 + $0x90] sm:$0xff]  ;;  %v201_v48 = vunpack.c.l.s4 %v1660_v47  ;;  %vm943_vm1 = vcmask 1041408  }
  0x38   :  { %v110_v5 = vld [vmem:[#allocation5 + $0x180] sm:$0xff]  ;;  %v111_v6 = vld [vmem:[#allocation5 + $0x188] sm:$0xff]  ;;  %v1288_v7 = vpack.c.bf16 %v63_v4, %v62_v2  ;;  %v81_v13 = vld [vmem:[#allocation5 + $0x98] sm:$0xff]  ;;  %v1735_v0 = vshrl.u32 %v203_v49, 7 }
  0x39   :  { %v1318_v8 = vpack.c.bf16 %v111_v6, %v110_v5  ;;  %v94_v9 = vld [vmem:[#allocation5 + $0x100] sm:$0xff]  ;;  %v95_v10 = vld [vmem:[#allocation5 + $0x108] sm:$0xff]  ;;  %1287 = vmatprep.subr.bf16.mxu0 %v1286_v3  ;;  %v64_v14 = vld [vmem:[#allocation5 + $0x10] sm:$0xff]  ;;  %v1290_v16 = vpack.c.bf16 %v81_v13, %v80_v11  ;;  %v202_v63 = vunpack.c.0.s8 %v201_v48 }
  0x3a   :  { %v1320_v12 = vpack.c.bf16 %v95_v10, %v94_v9  ;;  %v65_v15 = vld [vmem:[#allocation5 + $0x18] sm:$0xff]  ;;  %1289 = vmatpush3.bf16.msra.mxu0 %v1288_v7  ;;  %v112_v18 = vld [vmem:[#allocation5 + $0x190] sm:$0xff]  ;;  %v82_v23 = vld [vmem:[#allocation5 + $0xa0] sm:$0xff]  ;;  %vm983_vm2 = vcmp.lt.s32.totalorder %v1735_v0, 2 }
  0x3b   :  { %1319 = vmatprep.subr.bf16.mxu1 %v1318_v8  ;;  %v1292_v17 = vpack.c.bf16 %v65_v15, %v64_v14  ;;  %v113_v19 = vld [vmem:[#allocation5 + $0x198] sm:$0xff]  ;;  %v96_v20 = vld [vmem:[#allocation5 + $0x110] sm:$0xff]  ;;  %v83_v24 = vld [vmem:[#allocation5 + $0xa8] sm:$0xff]  ;;  %1291 = vmatprep.subr.bf16.mxu0 %v1290_v16  ;;  %v1738_v13 = vsub.s32 %v202_v63, %v1735_v0 }
  0x3c   :  { %1321 = vmatpush3.bf16.msra.mxu1 %v1320_v12  ;;  %v1322_v21 = vpack.c.bf16 %v113_v19, %v112_v18  ;;  %v97_v22 = vld [vmem:[#allocation5 + $0x118] sm:$0xff]  ;;  %v1294_v26 = vpack.c.bf16 %v83_v24, %v82_v23  ;;  %v66_v27 = vld [vmem:[#allocation5 + $0x20] sm:$0xff]  ;;  %v67_v28 = vld [vmem:[#allocation5 + $0x28] sm:$0xff] }
  0x3d   :  { %v1324_v25 = vpack.c.bf16 %v97_v22, %v96_v20  ;;  %v114_v29 = vld [vmem:[#allocation5 + $0x1a0] sm:$0xff]  ;;  %v115_v30 = vld [vmem:[#allocation5 + $0x1a8] sm:$0xff]  ;;  %v1296_v33 = vpack.c.bf16 %v67_v28, %v66_v27  ;;  %v84_v35 = vld [vmem:[#allocation5 + $0xb0] sm:$0xff] }
  0x3e   :  { %1323 = vmatprep.subr.bf16.mxu1 %v1322_v21  ;;  %v98_v31 = vld [vmem:[#allocation5 + $0x120] sm:$0xff]  ;;  %v99_v32 = vld [vmem:[#allocation5 + $0x128] sm:$0xff]  ;;  %1293 = vmatpush3.bf16.msra.mxu0 %v1292_v17  ;;  %v1326_v34 = vpack.c.bf16 %v115_v30, %v114_v29  ;;  %v85_v36 = vld [vmem:[#allocation5 + $0xb8] sm:$0xff] }
  0x3f   :  { %v68_v37 = vld [vmem:[#allocation5 + $0x30] sm:$0xff]  ;;  %1295 = vmatprep.subr.bf16.mxu0 %v1294_v26  ;;  %v1328_v38 = vpack.c.bf16 %v99_v32, %v98_v31  ;;  %v1298_v39 = vpack.c.bf16 %v85_v36, %v84_v35  ;;  %v69_v40 = vld [vmem:[#allocation5 + $0x38] sm:$0xff]  ;;  %v86_v46 = vld [vmem:[#allocation5 + $0xc0] sm:$0xff] }
  0x40   :  { %1325 = vmatpush3.bf16.msra.mxu1 %v1324_v25  ;;  %v116_v41 = vld [vmem:[#allocation5 + $0x1b0] sm:$0xff]  ;;  %v117_v42 = vld [vmem:[#allocation5 + $0x1b8] sm:$0xff]  ;;  %v87_v50 = vld [vmem:[#allocation5 + $0xc8] sm:$0xff]  ;;  %v1300_v51 = vpack.c.bf16 %v69_v40, %v68_v37 }
  0x41   :  { %1327 = vmatprep.subr.bf16.mxu1 %v1326_v34  ;;  %v1330_v43 = vpack.c.bf16 %v117_v42, %v116_v41  ;;  %v100_v44 = vld [vmem:[#allocation5 + $0x130] sm:$0xff]  ;;  %v101_v45 = vld [vmem:[#allocation5 + $0x138] sm:$0xff]  ;;  %v118_v52 = vld [vmem:[#allocation5 + $0x1c0] sm:$0xff]  ;;  %v1302_v55 = vpack.c.bf16 %v87_v50, %v86_v46 }
  0x42   :  { %1297 = vmatpush3.bf16.msra.mxu0 %v1296_v33  ;;  %v119_v53 = vld [vmem:[#allocation5 + $0x1c8] sm:$0xff]  ;;  %v1332_v54 = vpack.c.bf16 %v101_v45, %v100_v44  ;;  %v70_v56 = vld [vmem:[#allocation5 + $0x40] sm:$0xff]  ;;  %v88_v61 = vld [vmem:[#allocation5 + $0xd0] sm:$0xff] }
  0x43   :  { %1299 = vmatprep.subr.bf16.mxu0 %v1298_v39  ;;  %v71_v57 = vld [vmem:[#allocation5 + $0x48] sm:$0xff]  ;;  %v102_v58 = vld [vmem:[#allocation5 + $0x140] sm:$0xff]  ;;  %v1334_v59 = vpack.c.bf16 %v119_v53, %v118_v52  ;;  %v89_v62 = vld [vmem:[#allocation5 + $0xd8] sm:$0xff] }
  0x44   :  { %1329 = vmatpush3.bf16.msra.mxu1 %v1328_v38  ;;  %v103_v60 = vld [vmem:[#allocation5 + $0x148] sm:$0xff]  ;;  %v120_v1 = vld [vmem:[#allocation5 + $0x1d0] sm:$0xff]  ;;  %v121_v2 = vld [vmem:[#allocation5 + $0x1d8] sm:$0xff]  ;;  %v1304_v3 = vpack.c.bf16 %v71_v57, %v70_v56  ;;  %v1306_v5 = vpack.c.bf16 %v89_v62, %v88_v61 }
  0x45   :  { %1331 = vmatprep.subr.bf16.mxu1 %v1330_v43  ;;  %v1336_v4 = vpack.c.bf16 %v103_v60, %v102_v58  ;;  %v72_v6 = vld [vmem:[#allocation5 + $0x50] sm:$0xff]  ;;  %v73_v7 = vld [vmem:[#allocation5 + $0x58] sm:$0xff]  ;;  %v1338_v9 = vpack.c.bf16 %v121_v2, %v120_v1  ;;  %v90_v11 = vld [vmem:[#allocation5 + $0xe0] sm:$0xff] }
  0x46   :  { %1301 = vmatpush3.bf16.msra.mxu0 %v1300_v51  ;;  %v104_v8 = vld [vmem:[#allocation5 + $0x150] sm:$0xff]  ;;  %v105_v10 = vld [vmem:[#allocation5 + $0x158] sm:$0xff]  ;;  %v91_v12 = vld [vmem:[#allocation5 + $0xe8] sm:$0xff]  ;;  %v1308_v16 = vpack.c.bf16 %v73_v7, %v72_v6 }
  0x47   :  { %1303 = vmatprep.subr.bf16.mxu0 %v1302_v55  ;;  %v122_v14 = vld [vmem:[#allocation5 + $0x1e0] sm:$0xff]  ;;  %v123_v15 = vld [vmem:[#allocation5 + $0x1e8] sm:$0xff]  ;;  %v1340_v18 = vpack.c.bf16 %v105_v10, %v104_v8  ;;  %v1310_v19 = vpack.c.bf16 %v91_v12, %v90_v11  ;;  %v60_v22 = vld [vmem:[#allocation2] sm:$0xff] }
  0x48   :  { %1333 = vmatpush3.bf16.msra.mxu1 %v1332_v54  ;;  %v74_v17 = vld [vmem:[#allocation5 + $0x60] sm:$0xff]  ;;  %v75_v20 = vld [vmem:[#allocation5 + $0x68] sm:$0xff]  ;;  %v1342_v23 = vpack.c.bf16 %v123_v15, %v122_v14  ;;  %v92_v25 = vld [vmem:[#allocation5 + $0xf0] sm:$0xff]  ;;  %v1741_v27 = vrot.slane %v60_v22, %v1738_v13  ;;  %v199_v28 = vcombine.high %v60_v22, %v60_v22 }
  0x49   :  { %1335 = vmatprep.subr.bf16.mxu1 %v1334_v59  ;;  %v106_v21 = vld [vmem:[#allocation5 + $0x160] sm:$0xff]  ;;  %v107_v24 = vld [vmem:[#allocation5 + $0x168] sm:$0xff]  ;;  %v93_v26 = vld [vmem:[#allocation5 + $0xf8] sm:$0xff]  ;;  %v1312_v31 = vpack.c.bf16 %v75_v20, %v74_v17 }
  0x4a   :  { %1305 = vmatpush3.bf16.msra.mxu0 %v1304_v3  ;;  %v124_v29 = vld [vmem:[#allocation5 + $0x1f0] sm:$0xff]  ;;  %v125_v30 = vld [vmem:[#allocation5 + $0x1f8] sm:$0xff]  ;;  %v1745_v32 = vcombine.high %v1741_v27, %v1741_v27  ;;  %v1748_v33 = vrot.slane %v199_v28, %v1738_v13  ;;  %v1344_v34 = vpack.c.bf16 %v107_v24, %v106_v21  ;;  %v1314_v35 = vpack.c.bf16 %v93_v26, %v92_v25  ;;  %v142_v41 = vld [vmem:[#allocation5 + $0x280] sm:$0xff] }
  0x4b   :  { %1307 = vmatprep.subr.bf16.mxu0 %v1306_v5  ;;  %v76_v36 = vld [vmem:[#allocation5 + $0x70] sm:$0xff]  ;;  %v77_v37 = vld [vmem:[#allocation5 + $0x78] sm:$0xff]  ;;  %v1346_v39 = vpack.c.bf16 %v125_v30, %v124_v29  ;;  %v143_v42 = vld [vmem:[#allocation5 + $0x288] sm:$0xff] }
  0x4c   :  { %1337 = vmatpush3.bf16.msra.mxu1 %v1336_v4  ;;  %v108_v38 = vld [vmem:[#allocation5 + $0x170] sm:$0xff]  ;;  %v109_v40 = vld [vmem:[#allocation5 + $0x178] sm:$0xff]  ;;  %305 = vmatprep.mubr.f32.mxu0 %v1745_v32  ;;  %v1753_v43 = vcombine.high %v1748_v33, %v1748_v33  ;;  %v174_v44 = vld [vmem:[#allocation5 + $0x380] sm:$0xff]  ;;  %v1316_v46 = vpack.c.bf16 %v77_v37, %v76_v36  ;;  %v1350_v48 = vpack.c.bf16 %v143_v42, %v142_v41 }
  0x4d   :  { %1339 = vmatprep.subr.bf16.mxu1 %v1338_v9  ;;  %v175_v45 = vld [vmem:[#allocation5 + $0x388] sm:$0xff]  ;;  %v1348_v47 = vpack.c.bf16 %v109_v40, %v108_v38  ;;  %v126_v50 = vld [vmem:[#allocation5 + $0x200] sm:$0xff]  ;;  %v144_v55 = vld [vmem:[#allocation5 + $0x290] sm:$0xff] }
  0x4e   :  { %1309 = vmatpush3.bf16.msra.mxu0 %v1308_v16  ;;  %375 = vmatprep.mubr.f32.mxu1 %v1753_v43  ;;  %v127_v51 = vld [vmem:[#allocation5 + $0x208] sm:$0xff]  ;;  %v158_v52 = vld [vmem:[#allocation5 + $0x300] sm:$0xff]  ;;  %v1382_v53 = vpack.c.bf16 %v175_v45, %v174_v44  ;;  %v145_v56 = vld [vmem:[#allocation5 + $0x298] sm:$0xff] }
  0x4f   :  { %1311 = vmatprep.subr.bf16.mxu0 %v1310_v19  ;;  %v159_v54 = vld [vmem:[#allocation5 + $0x308] sm:$0xff]  ;;  %v176_v57 = vld [vmem:[#allocation5 + $0x390] sm:$0xff]  ;;  %v177_v58 = vld [vmem:[#allocation5 + $0x398] sm:$0xff]  ;;  %v1352_v59 = vpack.c.bf16 %v127_v51, %v126_v50  ;;  %v1354_v61 = vpack.c.bf16 %v145_v56, %v144_v55 }
  0x50   :  { %1341 = vmatpush3.bf16.msra.mxu1 %v1340_v18  ;;  %v1384_v60 = vpack.c.bf16 %v159_v54, %v158_v52  ;;  %v128_v62 = vld [vmem:[#allocation5 + $0x210] sm:$0xff]  ;;  %v129_v63 = vld [vmem:[#allocation5 + $0x218] sm:$0xff]  ;;  %v1386_v2 = vpack.c.bf16 %v177_v58, %v176_v57  ;;  %v146_v4 = vld [vmem:[#allocation5 + $0x2a0] sm:$0xff] }
  0x51   :  { %1343 = vmatprep.subr.bf16.mxu1 %v1342_v23  ;;  %v160_v1 = vld [vmem:[#allocation5 + $0x310] sm:$0xff]  ;;  %v161_v3 = vld [vmem:[#allocation5 + $0x318] sm:$0xff]  ;;  %v147_v5 = vld [vmem:[#allocation5 + $0x2a8] sm:$0xff]  ;;  %v1356_v8 = vpack.c.bf16 %v129_v63, %v128_v62 }
  0x52   :  { %1313 = vmatpush3.bf16.msra.mxu0 %v1312_v31  ;;  %v178_v6 = vld [vmem:[#allocation5 + $0x3a0] sm:$0xff]  ;;  %v179_v7 = vld [vmem:[#allocation5 + $0x3a8] sm:$0xff]  ;;  %v1388_v9 = vpack.c.bf16 %v161_v3, %v160_v1  ;;  %v1358_v10 = vpack.c.bf16 %v147_v5, %v146_v4  ;;  %v148_v17 = vld [vmem:[#allocation5 + $0x2b0] sm:$0xff] }
  0x53   :  { %1315 = vmatprep.subr.bf16.mxu0 %v1314_v35  ;;  %v130_v11 = vld [vmem:[#allocation5 + $0x220] sm:$0xff]  ;;  %v131_v12 = vld [vmem:[#allocation5 + $0x228] sm:$0xff]  ;;  %v1390_v15 = vpack.c.bf16 %v179_v7, %v178_v6  ;;  %v149_v18 = vld [vmem:[#allocation5 + $0x2b8] sm:$0xff] }
  0x54   :  { %1345 = vmatpush3.bf16.msra.mxu1 %v1344_v34  ;;  %v162_v14 = vld [vmem:[#allocation5 + $0x320] sm:$0xff]  ;;  %v163_v16 = vld [vmem:[#allocation5 + $0x328] sm:$0xff]  ;;  %v180_v19 = vld [vmem:[#allocation5 + $0x3b0] sm:$0xff]  ;;  %v1360_v21 = vpack.c.bf16 %v131_v12, %v130_v11  ;;  %v1362_v23 = vpack.c.bf16 %v149_v18, %v148_v17 }
  0x55   :  { %1347 = vmatprep.subr.bf16.mxu1 %v1346_v39  ;;  %v181_v20 = vld [vmem:[#allocation5 + $0x3b8] sm:$0xff]  ;;  %v1392_v22 = vpack.c.bf16 %v163_v16, %v162_v14  ;;  %v132_v24 = vld [vmem:[#allocation5 + $0x230] sm:$0xff]  ;;  %v150_v30 = vld [vmem:[#allocation5 + $0x2c0] sm:$0xff] }
  0x56   :  { %1317 = vmatpush3.bf16.msra.mxu0 %v1316_v46  ;;  %v133_v25 = vld [vmem:[#allocation5 + $0x238] sm:$0xff]  ;;  %v164_v26 = vld [vmem:[#allocation5 + $0x330] sm:$0xff]  ;;  %v1394_v28 = vpack.c.bf16 %v181_v20, %v180_v19  ;;  %v151_v31 = vld [vmem:[#allocation5 + $0x2c8] sm:$0xff] }
  0x57   :  { %1351 = vmatprep.subr.bf16.mxu0 %v1350_v48  ;;  %v165_v29 = vld [vmem:[#allocation5 + $0x338] sm:$0xff]  ;;  %v182_v34 = vld [vmem:[#allocation5 + $0x3c0] sm:$0xff]  ;;  %v183_v35 = vld [vmem:[#allocation5 + $0x3c8] sm:$0xff]  ;;  %v1364_v37 = vpack.c.bf16 %v133_v25, %v132_v24  ;;  %v1366_v41 = vpack.c.bf16 %v151_v31, %v150_v30 }
  0x58   :  { %1349 = vmatpush3.bf16.msra.mxu1 %v1348_v47  ;;  %v61_v36 = vld [vmem:[#allocation2 + $0x8] sm:$0xff]  ;;  %v1396_v40 = vpack.c.bf16 %v165_v29, %v164_v26  ;;  %v134_v42 = vld [vmem:[#allocation5 + $0x240] sm:$0xff]  ;;  %v135_v44 = vld [vmem:[#allocation5 + $0x248] sm:$0xff]  ;;  %v1398_v46 = vpack.c.bf16 %v183_v35, %v182_v34 }
  0x59   :  { %1383 = vmatprep.subr.bf16.mxu1 %v1382_v53  ;;  %306 = vmatmul.mubr.f32.vlgmr.msra.gmra.mrb[0].mxu0 %v1741_v27  ;;  %v1759_v38 = vrot.slane %v61_v36, %v1738_v13  ;;  %v216_v39 = vcombine.high %v61_v36, %v61_v36  ;;  %v166_v45 = vld [vmem:[#allocation5 + $0x340] sm:$0xff]  ;;  %v167_v47 = vld [vmem:[#allocation5 + $0x348] sm:$0xff]  ;;  %v152_v48 = vld [vmem:[#allocation5 + $0x2d0] sm:$0xff]  ;;  %v1368_v55 = vpack.c.bf16 %v135_v44, %v134_v42 }
  0x5a   :  { %1353 = vmatpush3.bf16.msra.mxu0 %v1352_v59  ;;  %v153_v50 = vld [vmem:[#allocation5 + $0x2d8] sm:$0xff]  ;;  %v184_v53 = vld [vmem:[#allocation5 + $0x3d0] sm:$0xff]  ;;  %v1400_v57 = vpack.c.bf16 %v167_v47, %v166_v45  ;;  %v154_v63 = vld [vmem:[#allocation5 + $0x2e0] sm:$0xff] }
  0x5b   :  { %376 = vmatmul.mubr.f32.vlgmr.msra.gmra.mrb[0].mxu1 %v1748_v33  ;;  %1355 = vmatprep.subr.bf16.mxu0 %v1354_v61  ;;  %v1763_v51 = vcombine.high %v1759_v38, %v1759_v38  ;;  %v1766_v52 = vrot.slane %v216_v39, %v1738_v13  ;;  %v185_v54 = vld [vmem:[#allocation5 + $0x3d8] sm:$0xff]  ;;  %v1370_v58 = vpack.c.bf16 %v153_v50, %v152_v48  ;;  %v136_v59 = vld [vmem:[#allocation5 + $0x250] sm:$0xff]  ;;  %v155_v1 = vld [vmem:[#allocation5 + $0x2e8] sm:$0xff] }
  0x5c   :  { %1385 = vmatpush3.bf16.msra.mxu1 %v1384_v60  ;;  %v137_v60 = vld [vmem:[#allocation5 + $0x258] sm:$0xff]  ;;  %v168_v61 = vld [vmem:[#allocation5 + $0x350] sm:$0xff]  ;;  %v1402_v13 = vpack.c.bf16 %v185_v54, %v184_v53  ;;  %v187_v3 = vld [vmem:[#allocation5 + $0x3e8] sm:$0xff]  ;;  %v1374_v6 = vpack.c.bf16 %v155_v1, %v154_v63 }
  0x5d   :  { %1387 = vmatprep.subr.bf16.mxu1 %v1386_v2  ;;  %445 = vmatprep.mubr.f32.mxu0 %v1763_v51  ;;  %v1771_v56 = vcombine.high %v1766_v52, %v1766_v52  ;;  %v169_v62 = vld [vmem:[#allocation5 + $0x358] sm:$0xff]  ;;  %v186_v2 = vld [vmem:[#allocation5 + $0x3e0] sm:$0xff]  ;;  %v1372_v4 = vpack.c.bf16 %v137_v60, %v136_v59  ;;  %v171_v11 = vld [vmem:[#allocation5 + $0x368] sm:$0xff] }
  0x5e   :  { %1357 = vmatpush3.bf16.msra.mxu0 %v1356_v8  ;;  %v1404_v5 = vpack.c.bf16 %v169_v62, %v168_v61  ;;  %v138_v7 = vld [vmem:[#allocation5 + $0x260] sm:$0xff]  ;;  %v139_v8 = vld [vmem:[#allocation5 + $0x268] sm:$0xff]  ;;  %v156_v12 = vld [vmem:[#allocation5 + $0x2f0] sm:$0xff] }
  0x5f   :  { %1359 = vmatprep.subr.bf16.mxu0 %v1358_v10  ;;  %515 = vmatprep.mubr.f32.mxu1 %v1771_v56  ;;  %v1406_v10 = vpack.c.bf16 %v187_v3, %v186_v2  ;;  %v157_v14 = vld [vmem:[#allocation5 + $0x2f8] sm:$0xff]  ;;  %v1376_v17 = vpack.c.bf16 %v139_v8, %v138_v7  ;;  %v140_v20 = vld [vmem:[#allocation5 + $0x270] sm:$0xff]  ;;  %v540_v25 = vld [vmem:[#allocation7 + $0x80] sm:$0xff] }
  0x60   :  { %1389 = vmatpush3.bf16.msra.mxu1 %v1388_v9  ;;  %v170_v9 = vld [vmem:[#allocation5 + $0x360] sm:$0xff]  ;;  %v189_v16 = vld [vmem:[#allocation5 + $0x3f8] sm:$0xff]  ;;  %v1378_v19 = vpack.c.bf16 %v157_v14, %v156_v12  ;;  %v541_v26 = vld [vmem:[#allocation7 + $0x88] sm:$0xff] }
  0x61   :  { %1391 = vmatprep.subr.bf16.mxu1 %v1390_v15  ;;  %v188_v15 = vld [vmem:[#allocation5 + $0x3f0] sm:$0xff]  ;;  %v1408_v18 = vpack.c.bf16 %v171_v11, %v170_v9  ;;  %v173_v24 = vld [vmem:[#allocation5 + $0x378] sm:$0xff]  ;;  %v573_v29 = vld [vmem:[#allocation7 + $0x188] sm:$0xff]  ;;  %v1414_v34 = vpack.c.bf16 %v541_v26, %v540_v25 }
  0x62   :  { %1361 = vmatpush3.bf16.msra.mxu0 %v1360_v21  ;;  %v141_v21 = vld [vmem:[#allocation5 + $0x278] sm:$0xff]  ;;  %v524_v35 = vld [vmem:[#allocation7] sm:$0xff]  ;;  %v525_v36 = vld [vmem:[#allocation7 + $0x8] sm:$0xff] }
  0x63   :  { %1363 = vmatprep.subr.bf16.mxu0 %v1362_v23  ;;  %v1410_v23 = vpack.c.bf16 %v189_v16, %v188_v15  ;;  %v1380_v30 = vpack.c.bf16 %v141_v21, %v140_v20  ;;  %v543_v42 = vld [vmem:[#allocation7 + $0x98] sm:$0xff]  ;;  %v574_v44 = vld [vmem:[#allocation7 + $0x190] sm:$0xff]  ;;  %v545_v59 = vld [vmem:[#allocation7 + $0xa8] sm:$0xff] }
  0x64   :  { %1393 = vmatpush3.bf16.msra.mxu1 %v1392_v22  ;;  %v172_v22 = vld [vmem:[#allocation5 + $0x370] sm:$0xff]  ;;  %v575_v45 = vld [vmem:[#allocation7 + $0x198] sm:$0xff]  ;;  %v576_v60 = vld [vmem:[#allocation7 + $0x1a0] sm:$0xff] }
  0x65   :  { %1395 = vmatprep.subr.bf16.mxu1 %v1394_v28  ;;  %v572_v28 = vld [vmem:[#allocation7 + $0x180] sm:$0xff]  ;;  %v1412_v31 = vpack.c.bf16 %v173_v24, %v172_v22  ;;  %v526_v50 = vld [vmem:[#allocation7 + $0x10] sm:$0xff]  ;;  %v527_v53 = vld [vmem:[#allocation7 + $0x18] sm:$0xff] }
  0x66   :  { %1365 = vmatpush3.bf16.msra.mxu0 %v1364_v37  ;;  %v556_v37 = vld [vmem:[#allocation7 + $0x100] sm:$0xff]  ;;  %v1446_v39 = vpack.c.bf16 %v573_v29, %v572_v28  ;;  %v558_v54 = vld [vmem:[#allocation7 + $0x110] sm:$0xff]  ;;  %v577_v61 = vld [vmem:[#allocation7 + $0x1a8] sm:$0xff] }
  0x67   :  { %1367 = vmatprep.subr.bf16.mxu0 %v1366_v41  ;;  %v542_v41 = vld [vmem:[#allocation7 + $0x90] sm:$0xff]  ;;  %v528_v1 = vld [vmem:[#allocation7 + $0x20] sm:$0xff]  ;;  %v529_v2 = vld [vmem:[#allocation7 + $0x28] sm:$0xff] }
  0x68   :  { %1397 = vmatpush3.bf16.msra.mxu1 %v1396_v40  ;;  %v557_v40 = vld [vmem:[#allocation7 + $0x108] sm:$0xff]  ;;  %v1418_v48 = vpack.c.bf16 %v543_v42, %v542_v41  ;;  %v560_v3 = vld [vmem:[#allocation7 + $0x120] sm:$0xff]  ;;  %v547_v7 = vld [vmem:[#allocation7 + $0xb8] sm:$0xff] }
  0x69   :  { %1399 = vmatprep.subr.bf16.mxu1 %v1398_v46  ;;  %v1416_v46 = vpack.c.bf16 %v525_v36, %v524_v35  ;;  %v1448_v47 = vpack.c.bf16 %v557_v40, %v556_v37  ;;  %v578_v8 = vld [vmem:[#allocation7 + $0x1b0] sm:$0xff]  ;;  %v579_v9 = vld [vmem:[#allocation7 + $0x1b8] sm:$0xff]  ;;  %v549_v20 = vld [vmem:[#allocation7 + $0xc8] sm:$0xff] }
  0x6a   :  { %1369 = vmatpush3.bf16.msra.mxu0 %v1368_v55  ;;  %v1450_v55 = vpack.c.bf16 %v575_v45, %v574_v44  ;;  %v530_v14 = vld [vmem:[#allocation7 + $0x30] sm:$0xff]  ;;  %v531_v15 = vld [vmem:[#allocation7 + $0x38] sm:$0xff]  ;;  %v580_v21 = vld [vmem:[#allocation7 + $0x1c0] sm:$0xff] }
  0x6b   :  { %1371 = vmatprep.subr.bf16.mxu0 %v1370_v58  ;;  %v544_v58 = vld [vmem:[#allocation7 + $0xa0] sm:$0xff]  ;;  %v562_v16 = vld [vmem:[#allocation7 + $0x130] sm:$0xff]  ;;  %v1428_v22 = vpack.c.bf16 %v531_v15, %v530_v14  ;;  %v533_v25 = vld [vmem:[#allocation7 + $0x48] sm:$0xff] }
  0x6c   :  { %1401 = vmatpush3.bf16.msra.mxu1 %v1400_v57  ;;  %v559_v57 = vld [vmem:[#allocation7 + $0x118] sm:$0xff]  ;;  %v1422_v63 = vpack.c.bf16 %v545_v59, %v544_v58  ;;  %v532_v24 = vld [vmem:[#allocation7 + $0x40] sm:$0xff]  ;;  %v565_v29 = vld [vmem:[#allocation7 + $0x148] sm:$0xff] }
  0x6d   :  { %1403 = vmatprep.subr.bf16.mxu1 %v1402_v13  ;;  %v1420_v13 = vpack.c.bf16 %v527_v53, %v526_v50  ;;  %v1452_v62 = vpack.c.bf16 %v559_v57, %v558_v54  ;;  %v564_v26 = vld [vmem:[#allocation7 + $0x140] sm:$0xff]  ;;  %v583_v35 = vld [vmem:[#allocation7 + $0x1d8] sm:$0xff]  ;;  %v1432_v36 = vpack.c.bf16 %v533_v25, %v532_v24  ;;  %v534_v40 = vld [vmem:[#allocation7 + $0x50] sm:$0xff] }
  0x6e   :  { %1373 = vmatpush3.bf16.msra.mxu0 %v1372_v4  ;;  %v1454_v4 = vpack.c.bf16 %v577_v61, %v576_v60  ;;  %v1464_v37 = vpack.c.bf16 %v565_v29, %v564_v26  ;;  %v535_v41 = vld [vmem:[#allocation7 + $0x58] sm:$0xff]  ;;  %v566_v42 = vld [vmem:[#allocation7 + $0x150] sm:$0xff]  ;;  %v585_v50 = vld [vmem:[#allocation7 + $0x1e8] sm:$0xff] }
  0x6f   :  { %1375 = vmatprep.subr.bf16.mxu0 %v1374_v6  ;;  %v546_v6 = vld [vmem:[#allocation7 + $0xb0] sm:$0xff]  ;;  %v567_v45 = vld [vmem:[#allocation7 + $0x158] sm:$0xff]  ;;  %v1436_v53 = vpack.c.bf16 %v535_v41, %v534_v40  ;;  %v536_v57 = vld [vmem:[#allocation7 + $0x60] sm:$0xff] }
  0x70   :  { %1405 = vmatpush3.bf16.msra.mxu1 %v1404_v5  ;;  %v561_v5 = vld [vmem:[#allocation7 + $0x128] sm:$0xff]  ;;  %v1426_v12 = vpack.c.bf16 %v547_v7, %v546_v6  ;;  %v1468_v54 = vpack.c.bf16 %v567_v45, %v566_v42  ;;  %v568_v59 = vld [vmem:[#allocation7 + $0x160] sm:$0xff]  ;;  %v539_v6 = vld [vmem:[#allocation7 + $0x78] sm:$0xff] }
  0x71   :  { %1407 = vmatprep.subr.bf16.mxu1 %v1406_v10  ;;  %v1424_v10 = vpack.c.bf16 %v529_v2, %v528_v1  ;;  %v1456_v11 = vpack.c.bf16 %v561_v5, %v560_v3  ;;  %v537_v58 = vld [vmem:[#allocation7 + $0x68] sm:$0xff]  ;;  %v587_v1 = vld [vmem:[#allocation7 + $0x1f8] sm:$0xff]  ;;  %v538_v5 = vld [vmem:[#allocation7 + $0x70] sm:$0xff] }
  0x72   :  { %1377 = vmatpush3.bf16.msra.mxu0 %v1376_v17  ;;  %v1458_v17 = vpack.c.bf16 %v579_v9, %v578_v8  ;;  %v569_v61 = vld [vmem:[#allocation7 + $0x168] sm:$0xff]  ;;  %v1440_v2 = vpack.c.bf16 %v537_v58, %v536_v57  ;;  %v570_v7 = vld [vmem:[#allocation7 + $0x170] sm:$0xff]  ;;  %v571_v9 = vld [vmem:[#allocation7 + $0x178] sm:$0xff]  ;;  %v1444_v15 = vpack.c.bf16 %v539_v6, %v538_v5 }
  0x73   :  { %1379 = vmatprep.subr.bf16.mxu0 %v1378_v19  ;;  %v548_v19 = vld [vmem:[#allocation7 + $0xc0] sm:$0xff]  ;;  %v1472_v3 = vpack.c.bf16 %v569_v61, %v568_v59  ;;  %v637_v14 = vld [vmem:[#allocation7 + $0x388] sm:$0xff]  ;;  %v639_v24 = vld [vmem:[#allocation7 + $0x398] sm:$0xff] }
  0x74   :  { %1409 = vmatpush3.bf16.msra.mxu1 %v1408_v18  ;;  %v563_v18 = vld [vmem:[#allocation7 + $0x138] sm:$0xff]  ;;  %v590_v29 = vld [vmem:[#allocation7 + $0x210] sm:$0xff]  ;;  %v641_v40 = vld [vmem:[#allocation7 + $0x3a8] sm:$0xff] }
  0x75   :  { %1411 = vmatprep.subr.bf16.mxu1 %v1410_v23  ;;  %v1430_v23 = vpack.c.bf16 %v549_v20, %v548_v19  ;;  %v589_v19 = vld [vmem:[#allocation7 + $0x208] sm:$0xff]  ;;  %v620_v20 = vld [vmem:[#allocation7 + $0x300] sm:$0xff]  ;;  %v594_v59 = vld [vmem:[#allocation7 + $0x230] sm:$0xff] }
  0x76   :  { %1381 = vmatpush3.bf16.msra.mxu0 %v1380_v30  ;;  %v550_v30 = vld [vmem:[#allocation7 + $0xd0] sm:$0xff]  ;;  %v592_v45 = vld [vmem:[#allocation7 + $0x220] sm:$0xff]  ;;  %v597_v6 = vld [vmem:[#allocation7 + $0x248] sm:$0xff] }
  0x77   :  { %1415 = vmatprep.subr.bf16.mxu0 %v1414_v34  ;;  %v582_v34 = vld [vmem:[#allocation7 + $0x1d0] sm:$0xff]  ;;  %v596_v5 = vld [vmem:[#allocation7 + $0x240] sm:$0xff] }
  0x78   :  { %1413 = vmatpush3.bf16.msra.mxu1 %v1412_v31  ;;  %v551_v31 = vld [vmem:[#allocation7 + $0xd8] sm:$0xff]  ;;  %v1466_v44 = vpack.c.bf16 %v583_v35, %v582_v34  ;;  %v626_v61 = vld [vmem:[#allocation7 + $0x330] sm:$0xff] }
  0x79   :  { %1447 = vmatprep.subr.bf16.mxu1 %v1446_v39  ;;  %446 = vmatmul.mubr.f32.vlgmr.msra.gmra.mrb[2].mxu0 %v1759_v38  ;;  %v1434_v39 = vpack.c.bf16 %v551_v31, %v550_v30  ;;  %v591_v30 = vld [vmem:[#allocation7 + $0x218] sm:$0xff]  ;;  %v622_v31 = vld [vmem:[#allocation7 + $0x310] sm:$0xff] }
  0x7a   :  { %1417 = vmatpush3.bf16.msra.mxu0 %v1416_v46  ;;  %723 = vmatprep.mubr.f32.mxu0 %v1745_v32  ;;  %v581_v32 = vld [vmem:[#allocation7 + $0x1c8] sm:$0xff]  ;;  %v552_v46 = vld [vmem:[#allocation7 + $0xe0] sm:$0xff]  ;;  %v623_v35 = vld [vmem:[#allocation7 + $0x318] sm:$0xff]  ;;  %v1484_v41 = vpack.c.bf16 %v591_v30, %v590_v29 }
  0x7b   :  { %516 = vmatmul.mubr.f32.vlgmr.msra.gmra.mrb[2].mxu1 %v1766_v52  ;;  %1419 = vmatprep.subr.bf16.mxu0 %v1418_v48  ;;  %v1462_v28 = vpack.c.bf16 %v581_v32, %v580_v21  ;;  %v584_v48 = vld [vmem:[#allocation7 + $0x1e0] sm:$0xff]  ;;  %v621_v32 = vld [vmem:[#allocation7 + $0x308] sm:$0xff]  ;;  %v1516_v42 = vpack.c.bf16 %v623_v35, %v622_v31 }
  0x7c   :  { %1449 = vmatpush3.bf16.msra.mxu1 %v1448_v47  ;;  %793 = vmatprep.mubr.f32.mxu1 %v1753_v43  ;;  %v1460_v43 = vpack.c.bf16 %v563_v18, %v562_v16  ;;  %v553_v47 = vld [vmem:[#allocation7 + $0xe8] sm:$0xff]  ;;  %v1470_v60 = vpack.c.bf16 %v585_v50, %v584_v48  ;;  %v1476_v16 = vpack.c.bf16 %v571_v9, %v570_v7  ;;  %v588_v18 = vld [vmem:[#allocation7 + $0x200] sm:$0xff] }
  0x7d   :  { %1451 = vmatprep.subr.bf16.mxu1 %v1450_v55  ;;  %v1438_v55 = vpack.c.bf16 %v553_v47, %v552_v46  ;;  %v1480_v25 = vpack.c.bf16 %v589_v19, %v588_v18  ;;  %v1512_v26 = vpack.c.bf16 %v621_v32, %v620_v20  ;;  %v593_v46 = vld [vmem:[#allocation7 + $0x228] sm:$0xff]  ;;  %v624_v47 = vld [vmem:[#allocation7 + $0x320] sm:$0xff]  ;;  %v598_v18 = vld [vmem:[#allocation7 + $0x250] sm:$0xff] }
  0x7e   :  { %1421 = vmatpush3.bf16.msra.mxu0 %v1420_v13  ;;  %v554_v13 = vld [vmem:[#allocation7 + $0xf0] sm:$0xff]  ;;  %v625_v50 = vld [vmem:[#allocation7 + $0x328] sm:$0xff]  ;;  %v628_v7 = vld [vmem:[#allocation7 + $0x340] sm:$0xff] }
  0x7f   :  { %1423 = vmatprep.subr.bf16.mxu0 %v1422_v63  ;;  %v586_v63 = vld [vmem:[#allocation7 + $0x1f0] sm:$0xff]  ;;  %v1520_v57 = vpack.c.bf16 %v625_v50, %v624_v47  ;;  %v629_v9 = vld [vmem:[#allocation7 + $0x348] sm:$0xff]  ;;  %v599_v19 = vld [vmem:[#allocation7 + $0x258] sm:$0xff] }
  0x80   :  { %1453 = vmatpush3.bf16.msra.mxu1 %v1452_v62  ;;  %v555_v62 = vld [vmem:[#allocation7 + $0xf8] sm:$0xff]  ;;  %v1474_v8 = vpack.c.bf16 %v587_v1, %v586_v63  ;;  %v612_v63 = vld [vmem:[#allocation7 + $0x2c0] sm:$0xff]  ;;  %v613_v1 = vld [vmem:[#allocation7 + $0x2c8] sm:$0xff] }
  0x81   :  { %1455 = vmatprep.subr.bf16.mxu1 %v1454_v4  ;;  %v1442_v4 = vpack.c.bf16 %v555_v62, %v554_v13  ;;  %v627_v62 = vld [vmem:[#allocation7 + $0x338] sm:$0xff]  ;;  %v630_v20 = vld [vmem:[#allocation7 + $0x350] sm:$0xff]  ;;  %v600_v29 = vld [vmem:[#allocation7 + $0x260] sm:$0xff] }
  0x82   :  { %1425 = vmatpush3.bf16.msra.mxu0 %v1424_v10  ;;  %v604_v10 = vld [vmem:[#allocation7 + $0x280] sm:$0xff]  ;;  %v631_v32 = vld [vmem:[#allocation7 + $0x358] sm:$0xff]  ;;  %v601_v30 = vld [vmem:[#allocation7 + $0x268] sm:$0xff] }
  0x83   :  { %1427 = vmatprep.subr.bf16.mxu0 %v1426_v12  ;;  %v636_v12 = vld [vmem:[#allocation7 + $0x380] sm:$0xff]  ;;  %v633_v35 = vld [vmem:[#allocation7 + $0x368] sm:$0xff]  ;;  %v635_v50 = vld [vmem:[#allocation7 + $0x378] sm:$0xff] }
  0x84   :  { %1457 = vmatpush3.bf16.msra.mxu1 %v1456_v11  ;;  %v605_v11 = vld [vmem:[#allocation7 + $0x288] sm:$0xff]  ;;  %v1510_v21 = vpack.c.bf16 %v637_v14, %v636_v12  ;;  %v646_v12 = vld [vmem:[#allocation7 + $0x3d0] sm:$0xff]  ;;  %v647_v14 = vld [vmem:[#allocation7 + $0x3d8] sm:$0xff] }
  0x85   :  { %1459 = vmatprep.subr.bf16.mxu1 %v1458_v17  ;;  %v1478_v17 = vpack.c.bf16 %v605_v11, %v604_v10  ;;  %v614_v10 = vld [vmem:[#allocation7 + $0x2d0] sm:$0xff]  ;;  %v615_v11 = vld [vmem:[#allocation7 + $0x2d8] sm:$0xff]  ;;  %v632_v31 = vld [vmem:[#allocation7 + $0x360] sm:$0xff] }
  0x86   :  { %1429 = vmatpush3.bf16.msra.mxu0 %v1428_v22  ;;  %v606_v22 = vld [vmem:[#allocation7 + $0x290] sm:$0xff] }
  0x87   :  { %1431 = vmatprep.subr.bf16.mxu0 %v1430_v23  ;;  %v638_v23 = vld [vmem:[#allocation7 + $0x390] sm:$0xff] }
  0x88   :  { %1461 = vmatpush3.bf16.msra.mxu1 %v1460_v43  ;;  %v607_v43 = vld [vmem:[#allocation7 + $0x298] sm:$0xff]  ;;  %v1514_v34 = vpack.c.bf16 %v639_v24, %v638_v23  ;;  %v648_v23 = vld [vmem:[#allocation7 + $0x3e0] sm:$0xff]  ;;  %v649_v24 = vld [vmem:[#allocation7 + $0x3e8] sm:$0xff] }
  0x89   :  { %1463 = vmatprep.subr.bf16.mxu1 %v1462_v28  ;;  %v1482_v28 = vpack.c.bf16 %v607_v43, %v606_v22  ;;  %v616_v22 = vld [vmem:[#allocation7 + $0x2e0] sm:$0xff]  ;;  %v617_v43 = vld [vmem:[#allocation7 + $0x2e8] sm:$0xff] }
  0x8a   :  { %1433 = vmatpush3.bf16.msra.mxu0 %v1432_v36  ;;  %v608_v36 = vld [vmem:[#allocation7 + $0x2a0] sm:$0xff] }
  0x8b   :  { %1435 = vmatprep.subr.bf16.mxu0 %v1434_v39  ;;  %v640_v39 = vld [vmem:[#allocation7 + $0x3a0] sm:$0xff] }
  0x8c   :  { %1465 = vmatpush3.bf16.msra.mxu1 %v1464_v37  ;;  %v609_v37 = vld [vmem:[#allocation7 + $0x2a8] sm:$0xff]  ;;  %v1518_v48 = vpack.c.bf16 %v641_v40, %v640_v39  ;;  %v650_v39 = vld [vmem:[#allocation7 + $0x3f0] sm:$0xff]  ;;  %v651_v40 = vld [vmem:[#allocation7 + $0x3f8] sm:$0xff] }
  0x8d   :  { %1467 = vmatprep.subr.bf16.mxu1 %v1466_v44  ;;  %v1486_v44 = vpack.c.bf16 %v609_v37, %v608_v36  ;;  %v618_v36 = vld [vmem:[#allocation7 + $0x2f0] sm:$0xff]  ;;  %v619_v37 = vld [vmem:[#allocation7 + $0x2f8] sm:$0xff]  ;;  %v1538_v47 = vpack.c.bf16 %v651_v40, %v650_v39 }
  0x8e   :  { %1437 = vmatpush3.bf16.msra.mxu0 %v1436_v53  ;;  %v610_v53 = vld [vmem:[#allocation7 + $0x2b0] sm:$0xff] }
  0x8f   :  { %1439 = vmatprep.subr.bf16.mxu0 %v1438_v55  ;;  %v643_v55 = vld [vmem:[#allocation7 + $0x3b8] sm:$0xff] }
  0x90   :  { %1469 = vmatpush3.bf16.msra.mxu1 %v1468_v54  ;;  %v611_v54 = vld [vmem:[#allocation7 + $0x2b8] sm:$0xff] }
  0x91   :  { %1471 = vmatprep.subr.bf16.mxu1 %v1470_v60  ;;  %v1490_v58 = vpack.c.bf16 %v611_v54, %v610_v53  ;;  %v595_v60 = vld [vmem:[#allocation7 + $0x238] sm:$0xff] }
  0x92   :  { %1441 = vmatpush3.bf16.msra.mxu0 %v1440_v2  ;;  %v644_v2 = vld [vmem:[#allocation7 + $0x3c0] sm:$0xff] }
  0x93   :  { %1443 = vmatprep.subr.bf16.mxu0 %v1442_v4  ;;  %v1494_v4 = vpack.c.bf16 %v613_v1, %v612_v63 }
  0x94   :  { %1473 = vmatpush3.bf16.msra.mxu1 %v1472_v3  ;;  %v1492_v3 = vpack.c.bf16 %v595_v60, %v594_v59 }
  0x95   :  { %1475 = vmatprep.subr.bf16.mxu1 %v1474_v8 }
  0x96   :  { %1445 = vmatpush3.bf16.msra.mxu0 %v1444_v15  ;;  %v1496_v15 = vpack.c.bf16 %v597_v6, %v596_v5 }
  0x97   :  { %1479 = vmatprep.subr.bf16.mxu0 %v1478_v17  ;;  %v1498_v17 = vpack.c.bf16 %v615_v11, %v614_v10 }
  0x98   :  { %1477 = vmatpush3.bf16.msra.mxu1 %v1476_v16  ;;  %v1528_v16 = vpack.c.bf16 %v629_v9, %v628_v7 }
  0x99   :  { %1511 = vmatprep.subr.bf16.mxu1 %v1510_v21  ;;  %724 = vmatmul.mubr.f32.vlgmr.msra.gmra.mrb[4].mxu0 %v1741_v27  ;;  %v642_v27 = vld [vmem:[#allocation7 + $0x3b0] sm:$0xff]  ;;  %v1530_v21 = vpack.c.bf16 %v647_v14, %v646_v12 }
  0x9a   :  { %1481 = vmatpush3.bf16.msra.mxu0 %v1480_v25  ;;  %863 = vmatprep.mubr.f32.mxu0 %v1763_v51  ;;  %v1522_v13 = vpack.c.bf16 %v643_v55, %v642_v27  ;;  %v645_v51 = vld [vmem:[#allocation7 + $0x3c8] sm:$0xff]  ;;  %v1500_v25 = vpack.c.bf16 %v599_v19, %v598_v18  ;;  %v1004_v55 = vld [vmem:[%s1825_s2] ss:$0 sm:$0xff] }
  0x9b   :  { %794 = vmatmul.mubr.f32.vlgmr.msra.gmra.mrb[4].mxu1 %v1748_v33  ;;  %1483 = vmatprep.subr.bf16.mxu0 %v1482_v28  ;;  %v1488_v33 = vpack.c.bf16 %v593_v46, %v592_v45  ;;  %v1526_v8 = vpack.c.bf16 %v645_v51, %v644_v2  ;;  %v1502_v28 = vpack.c.bf16 %v617_v43, %v616_v22  ;;  %v602_v45 = vld [vmem:[#allocation7 + $0x270] sm:$0xff]  ;;  %v603_v46 = vld [vmem:[#allocation7 + $0x278] sm:$0xff]  ;;  %v1788_v2 = vand.u32 127, %v203_v49 }
  0x9c   :  { %1513 = vmatpush3.bf16.msra.mxu1 %v1512_v26  ;;  %933 = vmatprep.mubr.f32.mxu1 %v1771_v56  ;;  %v1524_v56 = vpack.c.bf16 %v627_v62, %v626_v61  ;;  %v1532_v26 = vpack.c.bf16 %v631_v32, %v630_v20  ;;  %v1508_v53 = vpack.c.bf16 %v603_v46, %v602_v45  ;;  %v1005_v49 = vld [vmem:[%s1827_s4] ss:$0 sm:$0xff]  ;;  %s1661_s4 = smov [#allocation8]  }
  0x9d   :  { %1515 = vmatprep.subr.bf16.mxu1 %v1514_v34  ;;  %v1534_v34 = vpack.c.bf16 %v649_v24, %v648_v23  ;;  %vm523_vm0 = vcmp.lt.s32.totalorder %v1788_v2, 16  ;;  %s994_s6 = sshll.u32 %s1661_s4, 4  ;;  %vm985_vm3 = vcmp.eq.s32.totalorder %v1788_v2, 64  ;;  %s995_s6 = int_to_ptr.vmem [resolvable:$true] %s994_s6 }
  0x9e   :  { %1485 = vmatpush3.bf16.msra.mxu0 %v1484_v41  ;;  %v1504_v41 = vpack.c.bf16 %v601_v30, %v600_v29  ;;  %s1627_s7 = scalar_lea.vmem %s995_s6, 32  ;;  %p1632_p11 = scmp.lt.s32.totalorder %s995_s6, %s995_s6 }
  0x9f   :  { %1487 = vmatprep.subr.bf16.mxu0 %v1486_v44  ;;  %v1506_v44 = vpack.c.bf16 %v619_v37, %v618_v36  ;;  %p1628_p10 = scmp.ne.s32.totalorder %s995_s6, %s1627_s7  ;;  %p1633_p12 = scmp.lt.s32.totalorder %s1627_s7, %s1627_s7 }
  0xa0   :  { %1517 = vmatpush3.bf16.msra.mxu1 %v1516_v42  ;;  %v1536_v42 = vpack.c.bf16 %v633_v35, %v632_v31 }
  0xa1   :  { %1519 = vmatprep.subr.bf16.mxu1 %v1518_v48  ;;  %v634_v48 = vld [vmem:[#allocation7 + $0x370] sm:$0xff]  ;;  %p1634_p13 = por %p1633_p12, %p1632_p11 }
  0xa2   :  { %1489 = vmatpush3.bf16.msra.mxu0 %v1488_v33  ;;  %v1540_v54 = vpack.c.bf16 %v635_v50, %v634_v48 }
  0xa3   :  { %1491 = vmatprep.subr.bf16.mxu0 %v1490_v58  ;;  %p1635_p0 = pnand %p1634_p13, %p1628_p10 }
  0xa4   :  { %1521 = vmatpush3.bf16.msra.mxu1 %v1520_v57 }
  0xa5   :  { %1523 = vmatprep.subr.bf16.mxu1 %v1522_v13 }
  0xa6   :  { %1493 = vmatpush3.bf16.msra.mxu0 %v1492_v3 }
  0xa7   :  { %1495 = vmatprep.subr.bf16.mxu0 %v1494_v4 }
  0xa8   :  { %1525 = vmatpush3.bf16.msra.mxu1 %v1524_v56 }
  0xa9   :  { %1527 = vmatprep.subr.bf16.mxu1 %v1526_v8 }
  0xaa   :  { %1497 = vmatpush3.bf16.msra.mxu0 %v1496_v15 }
  0xab   :  { %1499 = vmatprep.subr.bf16.mxu0 %v1498_v17 }
  0xac   :  { %1529 = vmatpush3.bf16.msra.mxu1 %v1528_v16 }
  0xad   :  { %1531 = vmatprep.subr.bf16.mxu1 %v1530_v21 }
  0xae   :  { %1501 = vmatpush3.bf16.msra.mxu0 %v1500_v25 }
  0xaf   :  { %1503 = vmatprep.subr.bf16.mxu0 %v1502_v28 }
  0xb0   :  { %1533 = vmatpush3.bf16.msra.mxu1 %v1532_v26 }
  0xb1   :  { %1535 = vmatprep.subr.bf16.mxu1 %v1534_v34 }
  0xb2   :  { %1505 = vmatpush3.bf16.msra.mxu0 %v1504_v41 }
  0xb3   :  { %1507 = vmatprep.subr.bf16.mxu0 %v1506_v44 }
  0xb4   :  { %1537 = vmatpush3.bf16.msra.mxu1 %v1536_v42 }
  0xb5   :  { %1539 = vmatprep.subr.bf16.mxu1 %v1538_v47 }
  0xb6   :  { %1509 = vmatpush3.bf16.msra.mxu0 %v1508_v53 }
  0xb8   :  { %1541 = vmatpush3.bf16.msra.mxu1 %v1540_v54 }
  0xb9   :  { %864 = vmatmul.mubr.f32.vlgmr.msra.gmra.mrb[6].mxu0 %v1759_v38 }
  0xbb   :  { %934 = vmatmul.mubr.f32.vlgmr.msra.gmra.mrb[6].mxu1 %v1766_v52 }
 0x12c   :  { %v1038_v27 = vpop.f32.mrb[0].mxu0 }
 0x12d   :  { %v1039_v33 = vpop.f32.mrb[1].mxu0 }
 0x12e   :  { %v1073_v57 = vpop.f32.mrb[0].mxu1  ;;  %v1040_v58 = vadd.f32 %v1039_v33, %v1038_v27 }
 0x12f   :  { %v1074_v59 = vpop.f32.mrb[1].mxu1 }
 0x130   :  { %v1075_v60 = vadd.f32 %v1074_v59, %v1073_v57  ;;  %v308_v61 = vadd.f32 %v1040_v58, %v1004_v55 }
 0x132   :  { %v378_v13 = vadd.f32 %v1075_v60, %v308_v61 }
 0x14c   :  { %v1108_v62 = vpop.f32.mrb[2].mxu0 }
 0x14d   :  { %v1109_v63 = vpop.f32.mrb[3].mxu0 }
 0x14e   :  { %v1143_v1 = vpop.f32.mrb[2].mxu1  ;;  %v1110_v38 = vadd.f32 %v1109_v63, %v1108_v62 }
 0x14f   :  { %v1144_v52 = vpop.f32.mrb[3].mxu1 }
 0x150   :  { %v1145_v51 = vadd.f32 %v1144_v52, %v1143_v1  ;;  %v448_v3 = vadd.f32 %v1110_v38, %v378_v13 }
 0x152   :  { %v1791_v56 = vadd.f32 %v1145_v51, %v448_v3 }
 0x154   :  { %v939_v4 = vsel %vm523_vm0, %v1791_v56, -1e+30 }
 0x155   :  { %v941_v5 = vmul.f32 0.33333334, %v939_v4 }
 0x157   :  { %v944_v6 = vsel %vm943_vm1, %v941_v5, -inf }
 0x158   :  { %945 = vmax.xlane.f32.xlu0 %v944_v6 }
 0x16c   :  { %v1178_v7 = vpop.f32.mrb[4].mxu0 }
 0x16d   :  { %v1179_v8 = vpop.f32.mrb[5].mxu0 }
 0x16e   :  { %v1213_v9 = vpop.f32.mrb[4].mxu1  ;;  %v1180_v10 = vadd.f32 %v1179_v8, %v1178_v7 }
 0x16f   :  { %v1214_v11 = vpop.f32.mrb[5].mxu1 }
 0x170   :  { %v1215_v12 = vadd.f32 %v1214_v11, %v1213_v9  ;;  %v726_v14 = vadd.f32 %v1180_v10, %v1005_v49 }
 0x172   :  { %v796_v15 = vadd.f32 %v1215_v12, %v726_v14 }
 0x18c   :  { %v1248_v16 = vpop.f32.mrb[6].mxu0 }
 0x18d   :  { %v1249_v17 = vpop.f32.mrb[7].mxu0 }
 0x18e   :  { %v1283_v18 = vpop.f32.mrb[6].mxu1  ;;  %v1250_v19 = vadd.f32 %v1249_v17, %v1248_v16 }
 0x18f   :  { %v1284_v20 = vpop.f32.mrb[7].mxu1 }
 0x190   :  { %v1285_v21 = vadd.f32 %v1284_v20, %v1283_v18  ;;  %v866_v32 = vadd.f32 %v1250_v19, %v796_v15 }
 0x192   :  { %v936_v22 = vadd.f32 %v1285_v21, %v866_v32 }
 0x194   :  { %v940_v43 = vsel %vm523_vm0, %v936_v22, -1e+30 }
 0x195   :  { %v942_v23 = vmul.f32 0.33333334, %v940_v43 }
 0x197   :  { %v956_v24 = vsel %vm943_vm1, %v942_v23, -inf }
 0x198   :  { %957 = vmax.xlane.f32.xlu0 %v956_v24 }
 0x1e5   :  { %v946_v25 = vpop.xlane.xlu0 %945 }
 0x1e6   :  { %v947_v26 = vsub.f32 %v941_v5, %v946_v25 }
 0x1e8   :  { %v948_v28 = vmul.f32 1.442695, %v947_v26 }
 0x1ea   :  { %1551 = vpow2.f32 %v948_v28 }
 0x1f4   :  { %v1552_v29 = vpop.eup %1551 }
 0x1f5   :  { %v950_v30 = vsel %vm943_vm1, %v1552_v29, 0.0 }
 0x1f6   :  { %951 = vadd.xlane.f32.xlu1 %v950_v30 }
 0x225   :  { %v958_v31 = vpop.xlane.xlu0 %957 }
 0x226   :  { %v959_v34 = vsub.f32 %v942_v23, %v958_v31 }
 0x228   :  { %v960_v35 = vmul.f32 1.442695, %v959_v34 }
 0x22a   :  { %1553 = vpow2.f32 %v960_v35 }
 0x234   :  { %v1554_v36 = vpop.eup %1553 }
 0x235   :  { %v962_v37 = vsel %vm943_vm1, %v1554_v36, 0.0 }
 0x236   :  { %963 = vadd.xlane.f32.xlu1 %v962_v37 }
 0x283   :  { %v952_v39 = vpop.xlane.xlu1 %951 }
 0x284   :  { %1555 = vlog2.f32 %v952_v39 }
 0x28e   :  { %v1556_v41 = vpop.eup %1555 }
 0x28f   :  { %v954_v42 = vmul.f32 0.6931472, %v1556_v41 }
 0x291   :  { %v955_v47 = vsub.f32 %v947_v26, %v954_v42 }
 0x2c3   :  { %v964_v40 = vpop.xlane.xlu1 %963 }
 0x2c4   :  { %1557 = vlog2.f32 %v964_v40 }
 0x2c5   :  { %1559 = vrcp.f32 %v964_v40 }
 0x2ce   :  { %v1558_v44 = vpop.eup %1557 }
 0x2cf   :  { %v968_v45 = vmul.f32 0.6931472, %v1558_v44  ;;  %v1560_v46 = vpop.eup %1559 }
 0x2d0   :  { %v966_v50 = vmul.f32 %v1560_v46, %v1554_v36 }
 0x2d1   :  { %v969_v48 = vsub.f32 %v959_v34, %v968_v45 }
 0x2d3   :  { %v970_v53 = vsub.f32 %v969_v48, %v955_v47 }
 0x2d5   :  { %v971_v54 = vmul.f32 %v970_v53, %v966_v50 }
 0x2d7   :  { %v972_v27 = vsel %vm523_vm0, %v971_v54, 0.0 }
 0x2d8   :  { %v973_v55 = vsel %vm943_vm1, %v972_v27, 0.0 }
 0x2d9   :  { %974 = vadd.xlane.f32.xlu0 %v973_v55 }
 0x366   :  { %v975_v33 = vpop.xlane.xlu0 %974 }
 0x367   :  { %v976_v57 = vmul.f32 0.5625, %v975_v33 }
 0x369   :  { %v984_v58 = vsel %vm983_vm2, %v976_v57, 0.0 }
 0x36a   :  { %v986_v59 = vsel %vm985_vm3, %v984_v58, %v1791_v56 }
 0x36b   :  { %987 = vst [vmem:[#allocation8] sm:$0x3] %v986_v59 }
 0x36c   :  { %1638 = shalt.err (!%p1635_p0)
}
 0x36d   :  { %s1639_s10 = scalar_lea.hbm %s1828_s5, 32 }
 0x36e   :  { %p1640_p1 = scmp.ne.s32.totalorder %s1828_s5, %s1639_s10  ;;  %p1643_p2 = scmp.lt.u32.totalorder %s1639_s10, %s1828_s5 }
 0x370   :  { %p1645_p3 = pnand %p1643_p2, %p1640_p1 }
 0x372   :  { %1648 = shalt.err (!%p1645_p3)
}
 0x373   :  { %997 = dma.vmem_to_hbm [thread:$0]  %s995_s6, 32, %s1828_s5, [#allocation4]  }
 0x374   :  { %1653 = dma.done.wait [#allocation4], 32  }
 0x375   :  { %1654 = vsyncadd [#allocation4], 4294967264 }
 0x376   :  { %1001 = vsyncpa [#allocation3], 1 }
 0x377   :  { %1002 = vsyncpa [#allocation6], 1 }
 0x378   :  { %1003 = vsyncpa [#allocation4], 1 }

</bundles_post_ra>
